<compile_context>
chip_gen: v7x
topology: tpu7x:2x2x1
jax: 0.10.0
libtpu: 0.0.40
codegen_flags: <defaults>
</compile_context>

<pallas_src>
import functools
import math

import jax
import jax.numpy as jnp
from jax.experimental import pallas as pl
from jax.experimental.pallas import tpu as pltpu

# Static module configuration (mirrors __init__ args).
EMBED_DIM = 32
IMG_H, IMG_W = 64, 64           # input_image_size = (H, W)
NUM_POINT_EMBEDDINGS = 7        # BoxPromptEmbedder default (only first 4 used in forward)
NUM_USED_EMBEDDINGS = 4
TWO_PI = 2.0 * math.pi


def _box_prompt_kernel(pts_ref, lbl_ref, gauss_ref, wsin_ref, wcos_ref, out_ref):
    # pts_ref  : (2, B, M) f32  raw pixel coords (x plane, y plane); the pad
    #            column (if any) carries a -0.5 sentinel so the fused FMA below
    #            maps it to exactly -1 (== the reference's (0,0)/size*2 - 1).
    # lbl_ref  : (B, M) i32     (-1 in the pad column -> no embedding add)
    # gauss_ref: (2, half) f32  positional_encoding_gaussian_matrix
    # wsin_ref : (4, half) f32  point_embeddings[k].weight[:, :half]
    # wcos_ref : (4, half) f32  point_embeddings[k].weight[:, half:]
    # out_ref  : (B, M, 2*half) f32

    # Fused normalize, one FMA per coordinate:
    #   ((p + 0.5) / size) * 2 - 1  ==  p * (2/size) + (1/size - 1)
    x = pts_ref[0] * (2.0 / float(IMG_W)) + (1.0 / float(IMG_W) - 1.0)   # (B, M)
    y = pts_ref[1] * (2.0 / float(IMG_H)) + (1.0 / float(IMG_H) - 1.0)   # (B, M)

    # Fold 2*pi into the tiny (half,)-sized gaussian rows (2 muls instead of a
    # full (B, M, half) multiply).
    g0 = gauss_ref[0, :] * TWO_PI      # (half,)
    g1 = gauss_ref[1, :] * TWO_PI      # (half,)

    # K == 2 contraction as broadcasted VPU FMAs -- deliberately NOT the MXU.
    proj = x[:, :, None] * g0[None, None, :] + y[:, :, None] * g1[None, None, :]

    sin_p = jnp.sin(proj)              # (B, M, half)  EUP
    cos_p = jnp.cos(proj)              # (B, M, half)  EUP

    # Label-selected embedding adds, accumulated straight onto the sin/cos
    # halves.  Lane-0-aligned weight rows -> plain vld, no lane-offset slices.
    # This 4-way mask loop is VPU filler under the EUP (sin/cos) slack.
    lbl = lbl_ref[...]                 # (B, M) int32
    for k in range(NUM_USED_EMBEDDINGS):
        m = (lbl == k).astype(jnp.float32)[:, :, None]                    # (B, M, 1)
        sin_p = sin_p + m * wsin_ref[k][None, None, :]
        cos_p = cos_p + m * wcos_ref[k][None, None, :]

    # Single consolidated store of the whole block (no half-width masked
    # stores, no separate pad-row store path).
    out_ref[...] = jnp.concatenate([sin_p, cos_p], axis=-1)


@functools.partial(jax.jit, static_argnames=("pad",))
def box_prompt_embedder(points, labels, pad, gauss_mat, pe_weights):
    """points: (B, N, 2) f32 raw coords, labels: (B, N) i32.

    Returns (B, N + int(pad), EMBED_DIM) f32, matching the PyTorch forward.
    """
    points = points.astype(jnp.float32)
    labels = labels.astype(jnp.int32)
    B, N, _ = points.shape
    C = pe_weights.shape[1]
    half = C // 2

    if pad:
        # Pad raw coords with the -0.5 sentinel: under the kernel's fused FMA
        # (-0.5)*(2/W) + (1/W - 1) == -1 exactly, i.e. the reference's pad
        # point (0,0) (which does NOT receive the +0.5 shift).  Pad labels
        # with -1 so no embedding row is added.
        points = jnp.pad(points, ((0, 0), (0, 1), (0, 0)), constant_values=-0.5)
        labels = jnp.pad(labels, ((0, 0), (0, 1)), constant_values=-1)
    M = N + (1 if pad else 0)

    # Single layout op: put the x/y channel on the leading axis so the kernel
    # reads each coordinate plane with a cheap leading-dim ref index.
    pts_t = jnp.transpose(points, (2, 0, 1))                    # (2, B, M)

    # One-time wrapper-side split of the 4 used embedding rows into
    # lane-0-aligned sin/cos halves.
    w_sin = pe_weights[:NUM_USED_EMBEDDINGS, :half]             # (4, half)
    w_cos = pe_weights[:NUM_USED_EMBEDDINGS, half:]             # (4, half)

    cost = pl.CostEstimate(
        flops=12 * B * M * half,
        transcendentals=2 * B * M * half,
        bytes_accessed=4 * (2 * B * M            # pts
                            + B * M              # labels
                            + 2 * half           # gaussian
                            + 2 * NUM_USED_EMBEDDINGS * half   # weights
                            + B * M * C),        # output
    )

    vmem = pl.BlockSpec(memory_space=pltpu.MemorySpace.VMEM)
    return pl.pallas_call(
        _box_prompt_kernel,
        out_shape=jax.ShapeDtypeStruct((B, M, C), jnp.float32),
        in_specs=[vmem] * 5,
        out_specs=vmem,
        cost_estimate=cost,
    )(pts_t, labels, gauss_mat, w_sin, w_cos)


def _reference(points, labels, pad, gauss_mat, pe_weights):
    """Pure-JAX reference mirroring the PyTorch forward op-for-op."""
    points = points.astype(jnp.float32) + 0.5
    labels = labels.astype(jnp.int32)
    if pad:
        b = points.shape[0]
        points = jnp.concatenate([points, jnp.zeros((b, 1, 2), jnp.float32)], axis=1)
        labels = jnp.concatenate([labels, -jnp.ones((b, 1), jnp.int32)], axis=1)
    coords = points / jnp.array([float(IMG_W), float(IMG_H)], jnp.float32)
    coords = 2.0 * coords - 1.0
    proj = 2.0 * math.pi * (coords @ gauss_mat)
    pe = jnp.concatenate([jnp.sin(proj), jnp.cos(proj)], axis=-1)
    for k in range(NUM_USED_EMBEDDINGS):
        pe = pe + (labels == k)[..., None].astype(jnp.float32) * pe_weights[k][None, None, :]
    return pe


if __name__ == "__main__":
    key = jax.random.PRNGKey(0)
    k_pts, k_lbl, k_gauss, k_pe = jax.random.split(key, 4)

    B, N = 2, 8
    # Deterministic synthetic parameters (shapes implied by __init__):
    #   pe_layer.positional_encoding_gaussian_matrix : (2, EMBED_DIM // 2)
    #   point_embeddings[k].weight                   : (1, EMBED_DIM) each, k = 0..6
    gauss_mat = jax.random.normal(k_gauss, (2, EMBED_DIM // 2), dtype=jnp.float32)
    pe_weights = jax.random.normal(
        k_pe, (NUM_POINT_EMBEDDINGS, EMBED_DIM), dtype=jnp.float32)

    points = jax.random.uniform(k_pts, (B, N, 2), dtype=jnp.float32,
                                minval=0.0, maxval=float(min(IMG_H, IMG_W)))
    labels = jax.random.randint(k_lbl, (B, N), 0, NUM_USED_EMBEDDINGS, dtype=jnp.int32)

    out = box_prompt_embedder(points, labels, True, gauss_mat, pe_weights)
    out = jax.block_until_ready(out)

    ref = _reference(points, labels, True, gauss_mat, pe_weights)
    assert out.shape == (B, N + 1, EMBED_DIM), out.shape
    assert jnp.allclose(out, ref, atol=1e-4, rtol=1e-4), "mismatch vs reference"

    # Also check the no-pad path.
    out_np = jax.block_until_ready(
        box_prompt_embedder(points, labels, False, gauss_mat, pe_weights))
    ref_np = _reference(points, labels, False, gauss_mat, pe_weights)
    assert out_np.shape == (B, N, EMBED_DIM), out_np.shape
    assert jnp.allclose(out_np, ref_np, atol=1e-4, rtol=1e-4), "mismatch (no pad)"

    print("KERNEL_OK")
</pallas_src>

<mosaic_0001>
module attributes {stable_mosaic.version = 11 : i64} {
  func.func @_box_prompt_kernel(%arg0: memref<2x2x9xf32, #tpu.memory_space<vmem>>, %arg1: memref<2x9xi32, #tpu.memory_space<vmem>>, %arg2: memref<2x16xf32, #tpu.memory_space<vmem>>, %arg3: memref<4x16xf32, #tpu.memory_space<vmem>>, %arg4: memref<4x16xf32, #tpu.memory_space<vmem>>, %arg5: memref<2x9x32xf32, #tpu.memory_space<vmem>>) attributes {dimension_semantics = [], scalar_prefetch = 0 : i64, scratch_operands = 0 : i64, tpu.core_type = #tpu.core_type<tc>} {
    %c0 = arith.constant 0 : index
    %c0_0 = arith.constant 0 : index
    %c0_1 = arith.constant 0 : index
    %0 = vector.load %arg0[%c0, %c0_0, %c0_1] : memref<2x2x9xf32, #tpu.memory_space<vmem>>, vector<1x2x9xf32>
    %1 = vector.shape_cast %0 : vector<1x2x9xf32> to vector<2x9xf32>
    %cst = arith.constant 3.125000e-02 : f32
    %2 = vector.broadcast %cst : f32 to vector<2x9xf32>
    %3 = arith.mulf %1, %2 : vector<2x9xf32>
    %cst_2 = arith.constant -9.843750e-01 : f32
    %4 = vector.broadcast %cst_2 : f32 to vector<2x9xf32>
    %5 = arith.addf %3, %4 : vector<2x9xf32>
    %c1 = arith.constant 1 : index
    %c0_3 = arith.constant 0 : index
    %c0_4 = arith.constant 0 : index
    %6 = vector.load %arg0[%c1, %c0_3, %c0_4] : memref<2x2x9xf32, #tpu.memory_space<vmem>>, vector<1x2x9xf32>
    %7 = vector.shape_cast %6 : vector<1x2x9xf32> to vector<2x9xf32>
    %cst_5 = arith.constant 3.125000e-02 : f32
    %8 = vector.broadcast %cst_5 : f32 to vector<2x9xf32>
    %9 = arith.mulf %7, %8 : vector<2x9xf32>
    %cst_6 = arith.constant -9.843750e-01 : f32
    %10 = vector.broadcast %cst_6 : f32 to vector<2x9xf32>
    %11 = arith.addf %9, %10 : vector<2x9xf32>
    %c0_7 = arith.constant 0 : index
    %c0_8 = arith.constant 0 : index
    %12 = vector.load %arg2[%c0_7, %c0_8] : memref<2x16xf32, #tpu.memory_space<vmem>>, vector<1x16xf32>
    %13 = vector.shape_cast %12 : vector<1x16xf32> to vector<16xf32>
    %cst_9 = arith.constant 6.28318548 : f32
    %14 = vector.broadcast %cst_9 : f32 to vector<16xf32>
    %15 = arith.mulf %13, %14 : vector<16xf32>
    %c1_10 = arith.constant 1 : index
    %c0_11 = arith.constant 0 : index
    %16 = vector.load %arg2[%c1_10, %c0_11] : memref<2x16xf32, #tpu.memory_space<vmem>>, vector<1x16xf32>
    %17 = vector.shape_cast %16 : vector<1x16xf32> to vector<16xf32>
    %cst_12 = arith.constant 6.28318548 : f32
    %18 = vector.broadcast %cst_12 : f32 to vector<16xf32>
    %19 = arith.mulf %17, %18 : vector<16xf32>
    %20 = vector.shape_cast %5 : vector<2x9xf32> to vector<2x9x1xf32>
    %21 = vector.shape_cast %15 : vector<16xf32> to vector<1x1x16xf32>
    %22 = vector.broadcast %20 : vector<2x9x1xf32> to vector<2x9x16xf32>
    %23 = vector.broadcast %21 : vector<1x1x16xf32> to vector<2x9x16xf32>
    %24 = arith.mulf %22, %23 : vector<2x9x16xf32>
    %25 = vector.shape_cast %11 : vector<2x9xf32> to vector<2x9x1xf32>
    %26 = vector.shape_cast %19 : vector<16xf32> to vector<1x1x16xf32>
    %27 = vector.broadcast %25 : vector<2x9x1xf32> to vector<2x9x16xf32>
    %28 = vector.broadcast %26 : vector<1x1x16xf32> to vector<2x9x16xf32>
    %29 = arith.mulf %27, %28 : vector<2x9x16xf32>
    %30 = arith.addf %24, %29 : vector<2x9x16xf32>
    %31 = math.sin %30 : vector<2x9x16xf32>
    %32 = math.cos %30 : vector<2x9x16xf32>
    %c0_13 = arith.constant 0 : index
    %c0_14 = arith.constant 0 : index
    %33 = vector.load %arg1[%c0_13, %c0_14] : memref<2x9xi32, #tpu.memory_space<vmem>>, vector<2x9xi32>
    %c0_i32 = arith.constant 0 : i32
    %34 = vector.broadcast %c0_i32 : i32 to vector<2x9xi32>
    %35 = arith.cmpi eq, %33, %34 : vector<2x9xi32>
    %36 = arith.extui %35 : vector<2x9xi1> to vector<2x9xi32>
    %37 = arith.sitofp %36 : vector<2x9xi32> to vector<2x9xf32>
    %38 = vector.shape_cast %37 : vector<2x9xf32> to vector<2x9x1xf32>
    %c0_15 = arith.constant 0 : index
    %c0_16 = arith.constant 0 : index
    %39 = vector.load %arg3[%c0_15, %c0_16] : memref<4x16xf32, #tpu.memory_space<vmem>>, vector<1x16xf32>
    %40 = vector.shape_cast %39 : vector<1x16xf32> to vector<16xf32>
    %41 = vector.shape_cast %40 : vector<16xf32> to vector<1x1x16xf32>
    %42 = vector.broadcast %38 : vector<2x9x1xf32> to vector<2x9x16xf32>
    %43 = vector.broadcast %41 : vector<1x1x16xf32> to vector<2x9x16xf32>
    %44 = arith.mulf %42, %43 : vector<2x9x16xf32>
    %45 = arith.addf %31, %44 : vector<2x9x16xf32>
    %c0_17 = arith.constant 0 : index
    %c0_18 = arith.constant 0 : index
    %46 = vector.load %arg4[%c0_17, %c0_18] : memref<4x16xf32, #tpu.memory_space<vmem>>, vector<1x16xf32>
    %47 = vector.shape_cast %46 : vector<1x16xf32> to vector<16xf32>
    %48 = vector.shape_cast %47 : vector<16xf32> to vector<1x1x16xf32>
    %49 = vector.broadcast %38 : vector<2x9x1xf32> to vector<2x9x16xf32>
    %50 = vector.broadcast %48 : vector<1x1x16xf32> to vector<2x9x16xf32>
    %51 = arith.mulf %49, %50 : vector<2x9x16xf32>
    %52 = arith.addf %32, %51 : vector<2x9x16xf32>
    %c1_i32 = arith.constant 1 : i32
    %53 = vector.broadcast %c1_i32 : i32 to vector<2x9xi32>
    %54 = arith.cmpi eq, %33, %53 : vector<2x9xi32>
    %55 = arith.extui %54 : vector<2x9xi1> to vector<2x9xi32>
    %56 = arith.sitofp %55 : vector<2x9xi32> to vector<2x9xf32>
    %57 = vector.shape_cast %56 : vector<2x9xf32> to vector<2x9x1xf32>
    %c1_19 = arith.constant 1 : index
    %c0_20 = arith.constant 0 : index
    %58 = vector.load %arg3[%c1_19, %c0_20] : memref<4x16xf32, #tpu.memory_space<vmem>>, vector<1x16xf32>
    %59 = vector.shape_cast %58 : vector<1x16xf32> to vector<16xf32>
    %60 = vector.shape_cast %59 : vector<16xf32> to vector<1x1x16xf32>
    %61 = vector.broadcast %57 : vector<2x9x1xf32> to vector<2x9x16xf32>
    %62 = vector.broadcast %60 : vector<1x1x16xf32> to vector<2x9x16xf32>
    %63 = arith.mulf %61, %62 : vector<2x9x16xf32>
    %64 = arith.addf %45, %63 : vector<2x9x16xf32>
    %c1_21 = arith.constant 1 : index
    %c0_22 = arith.constant 0 : index
    %65 = vector.load %arg4[%c1_21, %c0_22] : memref<4x16xf32, #tpu.memory_space<vmem>>, vector<1x16xf32>
    %66 = vector.shape_cast %65 : vector<1x16xf32> to vector<16xf32>
    %67 = vector.shape_cast %66 : vector<16xf32> to vector<1x1x16xf32>
    %68 = vector.broadcast %57 : vector<2x9x1xf32> to vector<2x9x16xf32>
    %69 = vector.broadcast %67 : vector<1x1x16xf32> to vector<2x9x16xf32>
    %70 = arith.mulf %68, %69 : vector<2x9x16xf32>
    %71 = arith.addf %52, %70 : vector<2x9x16xf32>
    %c2_i32 = arith.constant 2 : i32
    %72 = vector.broadcast %c2_i32 : i32 to vector<2x9xi32>
    %73 = arith.cmpi eq, %33, %72 : vector<2x9xi32>
    %74 = arith.extui %73 : vector<2x9xi1> to vector<2x9xi32>
    %75 = arith.sitofp %74 : vector<2x9xi32> to vector<2x9xf32>
    %76 = vector.shape_cast %75 : vector<2x9xf32> to vector<2x9x1xf32>
    %c2 = arith.constant 2 : index
    %c0_23 = arith.constant 0 : index
    %77 = vector.load %arg3[%c2, %c0_23] : memref<4x16xf32, #tpu.memory_space<vmem>>, vector<1x16xf32>
    %78 = vector.shape_cast %77 : vector<1x16xf32> to vector<16xf32>
    %79 = vector.shape_cast %78 : vector<16xf32> to vector<1x1x16xf32>
    %80 = vector.broadcast %76 : vector<2x9x1xf32> to vector<2x9x16xf32>
    %81 = vector.broadcast %79 : vector<1x1x16xf32> to vector<2x9x16xf32>
    %82 = arith.mulf %80, %81 : vector<2x9x16xf32>
    %83 = arith.addf %64, %82 : vector<2x9x16xf32>
    %c2_24 = arith.constant 2 : index
    %c0_25 = arith.constant 0 : index
    %84 = vector.load %arg4[%c2_24, %c0_25] : memref<4x16xf32, #tpu.memory_space<vmem>>, vector<1x16xf32>
    %85 = vector.shape_cast %84 : vector<1x16xf32> to vector<16xf32>
    %86 = vector.shape_cast %85 : vector<16xf32> to vector<1x1x16xf32>
    %87 = vector.broadcast %76 : vector<2x9x1xf32> to vector<2x9x16xf32>
    %88 = vector.broadcast %86 : vector<1x1x16xf32> to vector<2x9x16xf32>
    %89 = arith.mulf %87, %88 : vector<2x9x16xf32>
    %90 = arith.addf %71, %89 : vector<2x9x16xf32>
    %c3_i32 = arith.constant 3 : i32
    %91 = vector.broadcast %c3_i32 : i32 to vector<2x9xi32>
    %92 = arith.cmpi eq, %33, %91 : vector<2x9xi32>
    %93 = arith.extui %92 : vector<2x9xi1> to vector<2x9xi32>
    %94 = arith.sitofp %93 : vector<2x9xi32> to vector<2x9xf32>
    %95 = vector.shape_cast %94 : vector<2x9xf32> to vector<2x9x1xf32>
    %c3 = arith.constant 3 : index
    %c0_26 = arith.constant 0 : index
    %96 = vector.load %arg3[%c3, %c0_26] : memref<4x16xf32, #tpu.memory_space<vmem>>, vector<1x16xf32>
    %97 = vector.shape_cast %96 : vector<1x16xf32> to vector<16xf32>
    %98 = vector.shape_cast %97 : vector<16xf32> to vector<1x1x16xf32>
    %99 = vector.broadcast %95 : vector<2x9x1xf32> to vector<2x9x16xf32>
    %100 = vector.broadcast %98 : vector<1x1x16xf32> to vector<2x9x16xf32>
    %101 = arith.mulf %99, %100 : vector<2x9x16xf32>
    %102 = arith.addf %83, %101 : vector<2x9x16xf32>
    %c3_27 = arith.constant 3 : index
    %c0_28 = arith.constant 0 : index
    %103 = vector.load %arg4[%c3_27, %c0_28] : memref<4x16xf32, #tpu.memory_space<vmem>>, vector<1x16xf32>
    %104 = vector.shape_cast %103 : vector<1x16xf32> to vector<16xf32>
    %105 = vector.shape_cast %104 : vector<16xf32> to vector<1x1x16xf32>
    %106 = vector.broadcast %95 : vector<2x9x1xf32> to vector<2x9x16xf32>
    %107 = vector.broadcast %105 : vector<1x1x16xf32> to vector<2x9x16xf32>
    %108 = arith.mulf %106, %107 : vector<2x9x16xf32>
    %109 = arith.addf %90, %108 : vector<2x9x16xf32>
    %110 = tpu.concatenate %102, %109 in 2 : vector<2x9x16xf32>, vector<2x9x16xf32> -> vector<2x9x32xf32>
    %c0_29 = arith.constant 0 : index
    %c0_30 = arith.constant 0 : index
    %c0_31 = arith.constant 0 : index
    %111 = vector.load %arg5[%c0_29, %c0_30, %c0_31] : memref<2x9x32xf32, #tpu.memory_space<vmem>>, vector<2x9x32xf32>
    tpu.vector_store %arg5[%c0_29, %c0_30, %c0_31], %110 {strides = array<i32>} : memref<2x9x32xf32, #tpu.memory_space<vmem>>, vector<2x9x32xf32>,
    return
  }
}

</mosaic_0001>

<bundles_post_ra>
// kernel: box_prompt_embedder.1
= control target key start
LH: loop header
LB: loop body
LE: loop exit
PB: predicated region body
PF: predicated region fallthrough
CT: control target
= control target key end

     0   :  { %v31_v0 = vlaneseq  ;;  %v1244_v15 = vmov 0.0   ;;  %s1731_s0 = inlined_call_operand.vmem [shape: f32[2,2,9], index: 0, kind: input, shape index: {}]   ;;  %s1732_s1 = inlined_call_operand.vmem [shape: s32[2,9], index: 1, kind: input, shape index: {}]   ;;  %s1733_s2 = inlined_call_operand.vmem [shape: f32[2,16], index: 2, kind: input, shape index: {}]   ;;  %s1734_s3 = inlined_call_operand.vmem [shape: f32[4,16], index: 3, kind: input, shape index: {}]   ;;  %s1735_s4 = inlined_call_operand.vmem [shape: f32[4,16], index: 4, kind: input, shape index: {}]   ;;  %s1736_s5 = inlined_call_operand.vmem [shape: f32[2,9,32], index: 5, kind: output, shape index: {}]  }
   0x1   :  { %v20_v1 = vld [vmem:[%s1731_s0] sm:$0x3]  ;;  %v1159_v2 = vld [vmem:[%s1731_s0 + $0x2] sm:$0x3] }
   0x2   :  { %v21_v3 = vmul.f32 0.03125, %v20_v1  ;;  %v32_v4 = vshrl.u32 %v31_v0, 7  ;;  %v25_v8 = vmul.f32 0.03125, %v1159_v2  ;;  %v923_v12 = vld [vmem:[%s1732_s1] sm:$0x3] }
   0x3   :  { %vm924_vm0 = vcmp.eq.s32.totalorder %v923_v12, 0  ;;  %vm975_vm1 = vcmp.eq.s32.totalorder %v923_v12, 1  ;;  %vm1026_vm2 = vcmp.eq.s32.totalorder %v923_v12, 2  ;;  %vm1077_vm3 = vcmp.eq.s32.totalorder %v923_v12, 3  ;;  %v27_v28 = vld [vmem:[%s1733_s2] sm:$0x1] }
   0x4   :  { %v22_v5 = vadd.f32 -0.984375, %v21_v3  ;;  %v33_v6 = vsub.s32 0, %v32_v4  ;;  %v44_v7 = vsub.s32 1, %v32_v4  ;;  %v26_v11 = vadd.f32 -0.984375, %v25_v8  ;;  %v29_v29 = vld [vmem:[%s1733_s2 + $0x1] sm:$0x1] }
   0x5   :  { %v1192_v16 = vsel %vm924_vm0, 1.0, %v1244_v15  ;;  %v1195_v19 = vsel %vm975_vm1, 1.0, %v1244_v15  ;;  %v1198_v22 = vsel %vm1026_vm2, 1.0, %v1244_v15  ;;  %v1201_v25 = vsel %vm1077_vm3, 1.0, %v1244_v15 }
   0x6   :  { %v45_v9 = vrot.slane %v22_v5, %v44_v7  ;;  %v34_v10 = vrot.slane %v22_v5, %v33_v6  ;;  %v64_v13 = vrot.slane %v26_v11, %v33_v6  ;;  %v75_v14 = vrot.slane %v26_v11, %v44_v7 }
   0x7   :  { %v930_v17 = vrot.slane %v1192_v16, %v33_v6  ;;  %v941_v18 = vrot.slane %v1192_v16, %v44_v7  ;;  %v981_v20 = vrot.slane %v1195_v19, %v33_v6  ;;  %v992_v21 = vrot.slane %v1195_v19, %v44_v7 }
   0x8   :  { %47 = vbcast.lane.b32.xlu1 %v45_v9, 256  ;;  %36 = vbcast.lane.b32.xlu0 %v34_v10, 256  ;;  %v1032_v23 = vrot.slane %v1198_v22, %v33_v6  ;;  %v1043_v24 = vrot.slane %v1198_v22, %v44_v7  ;;  %v1083_v26 = vrot.slane %v1201_v25, %v33_v6  ;;  %v28_v32 = vmul.f32 6.2831855, %v27_v28 }
   0x9   :  { %v1094_v27 = vrot.slane %v1201_v25, %v44_v7  ;;  %v30_v33 = vmul.f32 6.2831855, %v29_v29  ;;  %v1246_v22 = vmov 2475754826   ;;  %v1247_v25 = vmov 2131351028  }
   0xa   :  { %v56_v36 = vrot.slane %v28_v32, %v33_v6  ;;  %v1249_v29 = vmov 920167782  }
   0xb   :  { %v86_v37 = vrot.slane %v30_v33, %v33_v6 }
   0xc   :  { %51 = vbcast.lane.b32.xlu1 %v45_v9, 264  ;;  %40 = vbcast.lane.b32.xlu0 %v34_v10, 264 }
  0x10   :  { %70 = vbcast.lane.b32.xlu1 %v64_v13, 264  ;;  %66 = vbcast.lane.b32.xlu0 %v64_v13, 256 }
  0x14   :  { %81 = vbcast.lane.b32.xlu1 %v75_v14, 264  ;;  %77 = vbcast.lane.b32.xlu0 %v75_v14, 256 }
  0x18   :  { %936 = vbcast.lane.b32.xlu1 %v930_v17, 264  ;;  %932 = vbcast.lane.b32.xlu0 %v930_v17, 256 }
  0x1c   :  { %947 = vbcast.lane.b32.xlu1 %v941_v18, 264  ;;  %943 = vbcast.lane.b32.xlu0 %v941_v18, 256 }
  0x20   :  { %987 = vbcast.lane.b32.xlu1 %v981_v20, 264  ;;  %983 = vbcast.lane.b32.xlu0 %v981_v20, 256  ;;  %v1245_v20 = vmov 683565275  }
  0x24   :  { %998 = vbcast.lane.b32.xlu1 %v992_v21, 264  ;;  %994 = vbcast.lane.b32.xlu0 %v992_v21, 256 }
  0x28   :  { %1038 = vbcast.lane.b32.xlu1 %v1032_v23, 264  ;;  %1034 = vbcast.lane.b32.xlu0 %v1032_v23, 256 }
  0x2c   :  { %1049 = vbcast.lane.b32.xlu1 %v1043_v24, 264  ;;  %1045 = vbcast.lane.b32.xlu0 %v1043_v24, 256 }
  0x30   :  { %1089 = vbcast.lane.b32.xlu1 %v1083_v26, 264  ;;  %1085 = vbcast.lane.b32.xlu0 %v1083_v26, 256 }
  0x34   :  { %1100 = vbcast.lane.b32.xlu1 %v1094_v27, 264  ;;  %1096 = vbcast.lane.b32.xlu0 %v1094_v27, 256  ;;  %v1248_v27 = vmov 2102212464  }
  0x7a   :  { %v48_v30 = vpop.permute.xlu1 %47  ;;  %v37_v31 = vpop.permute.xlu0 %36 }
  0x7b   :  { %v57_v40 = vmul.f32 %v56_v36, %v37_v31  ;;  %v59_v60 = vmul.f32 %v56_v36, %v48_v30 }
  0x7e   :  { %v52_v34 = vpop.permute.xlu1 %51  ;;  %v41_v35 = vpop.permute.xlu0 %40 }
  0x7f   :  { %v58_v41 = vmul.f32 %v56_v36, %v41_v35  ;;  %v60_v51 = vmul.f32 %v56_v36, %v52_v34  ;;  %v1250_v36 = vmov 1326507024  }
  0x82   :  { %v71_v38 = vpop.permute.xlu1 %70  ;;  %v67_v39 = vpop.permute.xlu0 %66 }
  0x83   :  { %v88_v42 = vmul.f32 %v86_v37, %v71_v38  ;;  %v87_v43 = vmul.f32 %v86_v37, %v67_v39 }
  0x85   :  { %v1297_v44 = vadd.f32 %v88_v42, %v58_v41  ;;  %v1299_v45 = vadd.f32 %v87_v43, %v57_v40 }
  0x86   :  { %v82_v46 = vpop.permute.xlu1 %81  ;;  %v78_v47 = vpop.permute.xlu0 %77 }
  0x87   :  { %v199_v48 = vand.u32 2147483647, %v1297_v44  ;;  %v202_v49 = vand.u32 2139095040, %v1297_v44  ;;  %v95_v50 = vand.u32 2147483647, %v1299_v45  ;;  %v98_v52 = vand.u32 2139095040, %v1299_v45 }
  0x88   :  { %v90_v53 = vmul.f32 %v86_v37, %v82_v46  ;;  %v89_v57 = vmul.f32 %v86_v37, %v78_v47 }
  0x89   :  { %v203_v54 = vshrl.u32 %v202_v49, 23  ;;  %v206_v55 = vand.u32 8388607, %v199_v48  ;;  %v102_v56 = vand.u32 8388607, %v95_v50  ;;  %v99_v58 = vshrl.u32 %v98_v52, 23 }
  0x8a   :  { %v1309_v59 = vadd.f32 %v90_v53, %v60_v51  ;;  %v1312_v3 = vadd.f32 %v89_v57, %v59_v60 }
  0x8b   :  { %v1164_v61 = vadd.s32 4294967169, %v203_v54  ;;  %v207_v62 = vor.u32 8388608, %v206_v55  ;;  %v1160_v63 = vadd.s32 4294967169, %v99_v58  ;;  %v103_v0 = vor.u32 8388608, %v102_v56 }
  0x8c   :  { %v410_v1 = vand.u32 2139095040, %v1309_v59  ;;  %v407_v5 = vand.u32 2147483647, %v1309_v59  ;;  %v303_v14 = vand.u32 2147483647, %v1312_v3  ;;  %v306_v18 = vand.u32 2139095040, %v1312_v3 }
  0x8d   :  { %v209_v2 = vadd.s32 1, %v1164_v61  ;;  %v105_v4 = vadd.s32 1, %v1160_v63  ;;  %v1315_v7 = vshll.u32 %v207_v62, 8  ;;  %v1317_v9 = vshll.u32 %v103_v0, 8 }
  0x8e   :  { %v411_v6 = vshrl.u32 %v410_v1, 23  ;;  %v1324_v17 = vand.u32 8388607, %v407_v5 }
  0x8f   :  { %vm210_vm4 = vcmp.gt.s32.totalorder %v209_v2, 0  ;;  %vm106_vm5 = vcmp.gt.s32.totalorder %v105_v4, 0 }
  0x90   :  { %v211_v8 = vsel %vm210_vm4, %v209_v2, 0  ;;  %v1172_v10 = vadd.s32 4294967169, %v411_v6  ;;  %v107_v13 = vsel %vm106_vm5, %v105_v4, 0 }
  0x91   :  { %v212_v11 = vshrl.u32 %v211_v8, 5  ;;  %v213_v12 = vand.u32 31, %v211_v8  ;;  %v1320_v15 = vshrl.u32 %v107_v13, 5  ;;  %v109_v16 = vand.u32 31, %v107_v13 }
  0x92   :  { %v1329_v24 = vadd.s32 1, %v1172_v10 }
  0x93   :  { %v214_v19 = vsub.s32 32, %v213_v12  ;;  %v216_v21 = vshll.u32 %v1245_v20, %v213_v12  ;;  %v219_v23 = vshll.u32 %v1246_v22, %v213_v12  ;;  %v222_v26 = vshll.u32 %v1247_v25, %v213_v12 }
  0x94   :  { %v225_v28 = vshll.u32 %v1248_v27, %v213_v12  ;;  %v228_v30 = vshll.u32 %v1249_v29, %v213_v12  ;;  %vm231_vm6 = vcmp.lt.s32.totalorder %v212_v11, 1  ;;  %vm232_vm7 = vcmp.lt.s32.totalorder %v212_v11, 2 }
  0x95   :  { %v217_v31 = vshrl.u32 %v1246_v22, %v214_v19  ;;  %v220_v32 = vshrl.u32 %v1247_v25, %v214_v19  ;;  %v223_v33 = vshrl.u32 %v1248_v27, %v214_v19  ;;  %v215_v34 = vshrl.u32 %v1245_v20, %v214_v19 }
  0x96   :  { %v226_v35 = vshrl.u32 %v1249_v29, %v214_v19  ;;  %v229_v37 = vshrl.u32 %v1250_v36, %v214_v19  ;;  %vm233_vm8 = vcmp.lt.s32.totalorder %v212_v11, 3  ;;  %v110_v41 = vsub.s32 32, %v109_v16 }
  0x97   :  { %v218_v38 = vor.u32 %v217_v31, %v216_v21  ;;  %v221_v39 = vor.u32 %v220_v32, %v219_v23  ;;  %v224_v40 = vor.u32 %v223_v33, %v222_v26  ;;  %vm234_vm9 = vcmp.lt.s32.totalorder %v212_v11, 4 }
  0x98   :  { %v227_v42 = vor.u32 %v226_v35, %v225_v28  ;;  %v230_v43 = vor.u32 %v229_v37, %v228_v30  ;;  %v112_v46 = vshll.u32 %v1245_v20, %v109_v16  ;;  %v115_v56 = vshll.u32 %v1246_v22, %v109_v16 }
  0x99   :  { %v235_v47 = vsel %vm231_vm6, %v215_v34, %v218_v38  ;;  %v236_v49 = vsel %vm234_vm9, %v224_v40, 2102212464  ;;  %v239_v51 = vsel %vm231_vm6, %v218_v38, %v221_v39  ;;  %v243_v52 = vsel %vm231_vm6, %v221_v39, %v224_v40 }
  0x9a   :  { %v237_v53 = vsel %vm233_vm8, %v221_v39, %v236_v49  ;;  %v240_v54 = vsel %vm234_vm9, %v227_v42, 920167782  ;;  %v244_v55 = vsel %vm234_vm9, %v230_v43, 1326507024  ;;  %v111_v60 = vshrl.u32 %v1245_v20, %v110_v41 }
  0x9b   :  { %v241_v57 = vsel %vm233_vm8, %v224_v40, %v240_v54  ;;  %v245_v58 = vsel %vm233_vm8, %v227_v42, %v244_v55  ;;  %v113_v61 = vshrl.u32 %v1246_v22, %v110_v41  ;;  %v238_v62 = vsel %vm232_vm7, %v235_v47, %v237_v53 }
  0x9c   :  { %v242_v63 = vsel %vm232_vm7, %v239_v51, %v241_v57  ;;  %v246_v0 = vsel %vm232_vm7, %v243_v52, %v245_v58  ;;  %v116_v1 = vshrl.u32 %v1247_v25, %v110_v41  ;;  %v118_v13 = vshll.u32 %v1247_v25, %v109_v16 }
  0x9d   :  { %v1355_v2 = vmul.u32.u64.low %v1315_v7, %v246_v0  ;;  %v1356_v4 = vmul.u32.u64.high %v1315_v7, %v246_v0, %v1355_v2  ;;  %v1359_v6 = vmul.u32.u64.low %v1315_v7, %v242_v63  ;;  %v1360_v8 = vmul.u32.u64.high %v1315_v7, %v242_v63, %v1359_v6 }
  0x9e   :  { %v114_v10 = vor.u32 %v113_v61, %v112_v46  ;;  %v117_v12 = vor.u32 %v116_v1, %v115_v56  ;;  %v119_v19 = vshrl.u32 %v1248_v27, %v110_v41  ;;  %v254_v21 = vmul.u32 %v1315_v7, %v238_v62 }
  0x9f   :  { %v121_v11 = vshll.u32 %v1248_v27, %v109_v16  ;;  %v122_v23 = vshrl.u32 %v1249_v29, %v110_v41  ;;  %v125_v26 = vshrl.u32 %v1250_v36, %v110_v41  ;;  %v124_v30 = vshll.u32 %v1249_v29, %v109_v16 }
  0xa0   :  { %v120_v28 = vor.u32 %v119_v19, %v118_v13  ;;  %vm127_vm10 = vcmp.lt.s32.totalorder %v1320_v15, 1  ;;  %vm128_vm11 = vcmp.lt.s32.totalorder %v1320_v15, 2  ;;  %vm256_vm12 = vc.u32 %v1356_v4, %v1359_v6 }
  0xa1   :  { %v257_v31 = vadd.s32 1, %v1360_v8  ;;  %v123_v32 = vor.u32 %v122_v23, %v121_v11  ;;  %vm129_vm13 = vcmp.lt.s32.totalorder %v1320_v15, 3  ;;  %v126_v7 = vor.u32 %v125_v26, %v124_v30 }
  0xa2   :  { %vm130_vm14 = vcmp.lt.s32.totalorder %v1320_v15, 4  ;;  %v131_v33 = vsel %vm127_vm10, %v111_v60, %v114_v10  ;;  %v135_v34 = vsel %vm127_vm10, %v114_v10, %v117_v12  ;;  %v139_v38 = vsel %vm127_vm10, %v117_v12, %v120_v28 }
  0xa3   :  { %v258_v35 = vsel %vm256_vm12, %v257_v31, %v1360_v8  ;;  %v132_v37 = vsel %vm130_vm14, %v120_v28, 2102212464  ;;  %v136_v16 = vsel %vm130_vm14, %v123_v32, 920167782  ;;  %v140_v42 = vsel %vm130_vm14, %v126_v7, 1326507024 }
  0xa4   :  { %v259_v39 = vadd.s32 %v258_v35, %v254_v21  ;;  %v133_v40 = vsel %vm129_vm13, %v117_v12, %v132_v37  ;;  %v137_v41 = vsel %vm129_vm13, %v120_v28, %v136_v16  ;;  %v141_v46 = vsel %vm129_vm13, %v123_v32, %v140_v42 }
  0xa5   :  { %v138_v43 = vsel %vm128_vm11, %v135_v34, %v137_v41  ;;  %v415_v47 = vor.u32 8388608, %v1324_v17  ;;  %vm418_vm15 = vcmp.gt.s32.totalorder %v1329_v24, 0  ;;  %v142_v51 = vsel %vm128_vm11, %v139_v38, %v141_v46 }
  0xa6   :  { %v260_v49 = vadd.s32 536870912, %v259_v39  ;;  %v1383_v52 = vmul.u32.u64.low %v1317_v9, %v138_v43  ;;  %v1384_v53 = vmul.u32.u64.high %v1317_v9, %v138_v43, %v1383_v52  ;;  %v134_v54 = vsel %vm128_vm11, %v131_v33, %v133_v40 }
  0xa7   :  { %v1390_v55 = vmul.u32.u64.low %v1317_v9, %v142_v51  ;;  %v1391_v56 = vmul.u32.u64.high %v1317_v9, %v142_v51, %v1390_v55  ;;  %v419_v17 = vsel %vm418_vm15, %v1329_v24, 0  ;;  %v1397_v60 = vadd.s32 %v1359_v6, %v1356_v4 }
  0xa8   :  { %v1394_v57 = vshrl.u32 %v260_v49, 30  ;;  %v421_v58 = vand.u32 31, %v419_v17  ;;  %v1399_v61 = vshll.u32 %v415_v47, 8  ;;  %v307_v62 = vshrl.u32 %v306_v18, 23 }
  0xa9   :  { %v1405_v15 = vand.u32 8388607, %v303_v14  ;;  %v150_v0 = vmul.u32 %v1317_v9, %v134_v54  ;;  %v153_v24 = vadd.s32 1, %v1384_v53  ;;  %vm152_vm0 = vc.u32 %v1391_v56, %v1383_v52 }
  0xaa   :  { %v262_v63 = vshll.u32 %v1394_v57, 30  ;;  %v422_v1 = vsub.s32 32, %v421_v58  ;;  %v420_v2 = vshrl.u32 %v419_v17, 5  ;;  %v424_v4 = vshll.u32 %v1245_v20, %v421_v58 }
  0xab   :  { %v427_v6 = vshll.u32 %v1246_v22, %v421_v58  ;;  %v154_v8 = vsel %vm152_vm0, %v153_v24, %v1384_v53  ;;  %v430_v12 = vshll.u32 %v1247_v25, %v421_v58  ;;  %v433_v21 = vshll.u32 %v1248_v27, %v421_v58 }
  0xac   :  { %v1414_v18 = vsub.s32 %v259_v39, %v262_v63  ;;  %v425_v10 = vshrl.u32 %v1246_v22, %v422_v1  ;;  %v155_v9 = vadd.s32 %v154_v8, %v150_v0  ;;  %v428_v13 = vshrl.u32 %v1247_v25, %v422_v1 }
  0xad   :  { %v431_v19 = vshrl.u32 %v1248_v27, %v422_v1  ;;  %v434_v26 = vshrl.u32 %v1249_v29, %v422_v1  ;;  %v436_v28 = vshll.u32 %v1249_v29, %v421_v58  ;;  %v437_v7 = vshrl.u32 %v1250_v36, %v422_v1 }
  0xae   :  { %v265_v11 = vsub.s32 0, %v1414_v18  ;;  %v426_v23 = vor.u32 %v425_v10, %v424_v4  ;;  %v156_v30 = vadd.s32 536870912, %v155_v9  ;;  %v429_v31 = vor.u32 %v428_v13, %v427_v6 }
  0xaf   :  { %v432_v32 = vor.u32 %v431_v19, %v430_v12  ;;  %v423_v34 = vshrl.u32 %v1245_v20, %v422_v1  ;;  %v435_v35 = vor.u32 %v434_v26, %v433_v21  ;;  %v1168_v37 = vadd.s32 4294967169, %v307_v62 }
  0xb0   :  { %v1165_v33 = vmin.u32 %v265_v11, %v1414_v18  ;;  %v1428_v16 = vshrl.u32 %v156_v30, 30  ;;  %v438_v38 = vor.u32 %v437_v7, %v436_v28  ;;  %vm439_vm1 = vcmp.lt.s32.totalorder %v420_v2, 1 }
  0xb1   :  { %vm442_vm2 = vcmp.lt.s32.totalorder %v420_v2, 4  ;;  %vm440_vm3 = vcmp.lt.s32.totalorder %v420_v2, 2  ;;  %v447_v41 = vsel %vm439_vm1, %v426_v23, %v429_v31  ;;  %vm441_vm4 = vcmp.lt.s32.totalorder %v420_v2, 3 }
  0xb2   :  { %v267_v39 = vclz %v1165_v33  ;;  %v444_v40 = vsel %vm442_vm2, %v432_v32, 2102212464  ;;  %v158_v42 = vshll.u32 %v1428_v16, 30  ;;  %v448_v43 = vsel %vm442_vm2, %v435_v35, 920167782 }
  0xb3   :  { %v451_v46 = vsel %vm439_vm1, %v429_v31, %v432_v32  ;;  %v443_v49 = vsel %vm439_vm1, %v423_v34, %v426_v23  ;;  %v449_v51 = vsel %vm441_vm4, %v432_v32, %v448_v43  ;;  %v452_v53 = vsel %vm442_vm2, %v438_v38, 1326507024 }
  0xb4   :  { %v1166_v47 = vadd.s32 4294967294, %v267_v39  ;;  %v1431_v54 = vsub.s32 %v155_v9, %v158_v42  ;;  %v445_v55 = vsel %vm441_vm4, %v429_v31, %v444_v40  ;;  %v450_v17 = vsel %vm440_vm3, %v447_v41, %v449_v51 }
  0xb5   :  { %v453_v58 = vsel %vm441_vm4, %v435_v35, %v452_v53  ;;  %v1436_v63 = vmul.u32.u64.low %v1399_v61, %v450_v17  ;;  %v1437_v0 = vmul.u32.u64.high %v1399_v61, %v450_v17, %v1436_v63  ;;  %v446_v12 = vsel %vm440_vm3, %v443_v49, %v445_v55 }
  0xb6   :  { %vm1167_vm5 = vcmp.lt.s32.totalorder %v1166_v47, 0  ;;  %v454_v62 = vsel %vm440_vm3, %v451_v46, %v453_v58  ;;  %v161_v1 = vsub.s32 0, %v1431_v54  ;;  %v313_v9 = vadd.s32 1, %v1168_v37 }
  0xb7   :  { %v270_v24 = vsel %vm1167_vm5, 0, %v1166_v47  ;;  %v1442_v4 = vmul.u32.u64.low %v1399_v61, %v454_v62  ;;  %v1443_v6 = vmul.u32.u64.high %v1399_v61, %v454_v62, %v1442_v4  ;;  %v311_v21 = vor.u32 8388608, %v1405_v15 }
  0xb8   :  { %v271_v8 = vsub.s32 32, %v270_v24  ;;  %v275_v10 = vsub.s32 4294967266, %v270_v24  ;;  %v272_v13 = vshll.u32 %v1414_v18, %v270_v24  ;;  %v1161_v19 = vmin.u32 %v161_v1, %v1431_v54 }
  0xb9   :  { %v285_v11 = vsub.s32 4, %v1394_v57  ;;  %v465_v28 = vadd.s32 1, %v1437_v0  ;;  %vm314_vm6 = vcmp.gt.s32.totalorder %v313_v9, 0  ;;  %v462_v31 = vmul.u32 %v1399_v61, %v446_v12 }
  0xba   :  { %v273_v23 = vshrl.u32 %v1397_v60, %v271_v8  ;;  %v276_v26 = vadd.s32 127, %v275_v10  ;;  %v163_v30 = vclz %v1161_v19  ;;  %vm464_vm7 = vc.u32 %v1443_v6, %v1436_v63 }
  0xbb   :  { %v315_v2 = vsel %vm314_vm6, %v313_v9, 0  ;;  %v466_v7 = vsel %vm464_vm7, %v465_v28, %v1437_v0  ;;  %vm201_vm8 = vcmp.lt.s32.totalorder %v1297_v44, 0  ;;  %v151_v37 = vadd.s32 %v1383_v52, %v1391_v56 }
  0xbc   :  { %v274_v18 = vor.u32 %v273_v23, %v272_v13  ;;  %v277_v32 = vshll.u32 %v276_v26, 23  ;;  %v1456_v15 = vshrl.u32 %v315_v2, 5  ;;  %v1162_v60 = vadd.s32 4294967294, %v163_v30 }
  0xbd   :  { %v467_v33 = vadd.s32 %v466_v7, %v462_v31  ;;  %v317_v34 = vand.u32 31, %v315_v2  ;;  %v1461_v61 = vshll.u32 %v311_v21, 8  ;;  %v1466_v38 = vsel %vm201_vm8, %v285_v11, %v1394_v57 }
  0xbe   :  { %v278_v35 = vor.u32 4788187, %v277_v32  ;;  %v281_v39 = vcvt.s32.f32 %v274_v18  ;;  %vm1163_vm9 = vcmp.lt.s32.totalorder %v1162_v60, 0  ;;  %vm335_vm10 = vcmp.lt.s32.totalorder %v1456_v15, 1 }
  0xbf   :  { %v468_v40 = vadd.s32 536870912, %v467_v33  ;;  %v318_v41 = vsub.s32 32, %v317_v34  ;;  %v166_v43 = vsel %vm1163_vm9, 0, %v1162_v60  ;;  %v320_v46 = vshll.u32 %v1245_v20, %v317_v34 }
  0xc0   :  { %v279_v42 = vand.u32 2147483647, %v278_v35  ;;  %v167_v47 = vsub.s32 32, %v166_v43  ;;  %v171_v49 = vsub.s32 4294967266, %v166_v43  ;;  %v323_v56 = vshll.u32 %v1246_v22, %v317_v34 }
  0xc1   :  { %v1470_v52 = vshrl.u32 %v468_v40, 30  ;;  %v168_v57 = vshll.u32 %v1431_v54, %v166_v43  ;;  %v321_v53 = vshrl.u32 %v1246_v22, %v318_v41  ;;  %v324_v55 = vshrl.u32 %v1247_v25, %v318_v41 }
  0xc2   :  { %v282_v51 = vmul.f32 %v281_v39, %v279_v42  ;;  %v169_v17 = vshrl.u32 %v151_v37, %v167_v47  ;;  %v172_v58 = vadd.s32 127, %v171_v49  ;;  %v327_v0 = vshrl.u32 %v1248_v27, %v318_v41 }
  0xc3   :  { %v470_v62 = vshll.u32 %v1470_v52, 30  ;;  %vm1480_vm11 = vcmp.le.f32.partialorder %v199_v48, 0.7853982  ;;  %v322_v4 = vor.u32 %v321_v53, %v320_v46  ;;  %v325_v8 = vor.u32 %v324_v55, %v323_v56 }
  0xc4   :  { %v283_v1 = vxor.u32 2147483648, %v282_v51  ;;  %v326_v54 = vshll.u32 %v1247_v25, %v317_v34  ;;  %v170_v22 = vor.u32 %v169_v17, %v168_v57  ;;  %v173_v10 = vshll.u32 %v172_v58, 23 }
  0xc5   :  { %v1485_v12 = vsub.s32 %v467_v33, %v470_v62  ;;  %v329_v9 = vshll.u32 %v1248_v27, %v317_v34  ;;  %v330_v19 = vshrl.u32 %v1249_v29, %v318_v41  ;;  %v332_v21 = vshll.u32 %v1249_v29, %v317_v34 }
  0xc6   :  { %v328_v13 = vor.u32 %v327_v0, %v326_v54  ;;  %v333_v48 = vshrl.u32 %v1250_v36, %v318_v41  ;;  %v284_v11 = vsel %vm201_vm8, %v283_v1, %v282_v51  ;;  %v174_v23 = vor.u32 4788187, %v173_v10  ;;  %v1527_v51 = vpop.permute.xlu1 %936 }
  0xc7   :  { %v473_v26 = vsub.s32 0, %v1485_v12  ;;  %v319_v25 = vshrl.u32 %v1245_v20, %v318_v41  ;;  %v177_v28 = vcvt.s32.f32 %v170_v22  ;;  %v331_v30 = vor.u32 %v330_v19, %v329_v9  ;;  %v1545_v22 = vpop.permute.xlu0 %932 }
  0xc8   :  { %v334_v31 = vor.u32 %v333_v48, %v332_v21  ;;  %vm337_vm12 = vcmp.lt.s32.totalorder %v1456_v15, 3  ;;  %v175_v27 = vand.u32 2147483647, %v174_v23  ;;  %vm338_vm13 = vcmp.lt.s32.totalorder %v1456_v15, 4 }
  0xc9   :  { %v1173_v2 = vmin.u32 %v473_v26, %v1485_v12  ;;  %v343_v29 = vsel %vm335_vm10, %v322_v4, %v325_v8  ;;  %v340_v36 = vsel %vm338_vm13, %v328_v13, 2102212464  ;;  %v344_v18 = vsel %vm338_vm13, %v331_v30, 920167782 }
  0xca   :  { %v347_v32 = vsel %vm335_vm10, %v325_v8, %v328_v13  ;;  %v348_v7 = vsel %vm338_vm13, %v334_v31, 1326507024  ;;  %v178_v20 = vmul.f32 %v177_v28, %v175_v27  ;;  %vm336_vm14 = vcmp.lt.s32.totalorder %v1456_v15, 2  ;;  %v1553_v10 = vpop.permute.xlu1 %947 }
  0xcb   :  { %v475_v60 = vclz %v1173_v2  ;;  %v345_v33 = vsel %vm337_vm12, %v328_v13, %v344_v18  ;;  %v339_v34 = vsel %vm335_vm10, %v319_v25, %v322_v4  ;;  %v349_v37 = vsel %vm337_vm12, %v331_v30, %v348_v7  ;;  %v1564_v28 = vpop.permute.xlu0 %943 }
  0xcc   :  { %v346_v35 = vsel %vm336_vm14, %v343_v29, %v345_v33  ;;  %v287_v39 = vsel %vm1480_vm11, %v1297_v44, %v284_v11  ;;  %v179_v40 = vxor.u32 2147483648, %v178_v20  ;;  %v341_v42 = vsel %vm337_vm12, %v325_v8, %v340_v36  ;;  %v1559_v11 = vld [vmem:[%s1734_s3] ss:$0 sm:$0xff] }
  0xcd   :  { %v1174_v41 = vadd.s32 4294967294, %v475_v60  ;;  %v350_v43 = vsel %vm336_vm14, %v347_v32, %v349_v37  ;;  %v1523_v49 = vmul.u32.u64.low %v1461_v61, %v346_v35  ;;  %v1524_v56 = vmul.u32.u64.high %v1461_v61, %v346_v35, %v1523_v49 }
  0xce   :  { %v1519_v46 = vmul.u32.u64.low %v1461_v61, %v350_v43  ;;  %v1520_v47 = vmul.u32.u64.high %v1461_v61, %v350_v43, %v1519_v46  ;;  %v288_v57 = vsel %vm1480_vm11, 0, %v1466_v38  ;;  %1228 = vcosq.f32 %v287_v39  ;;  %v1569_v36 = vpop.permute.xlu1 %987 }
  0xcf   :  { %vm1175_vm15 = vcmp.lt.s32.totalorder %v1174_v41, 0  ;;  %v342_v55 = vsel %vm336_vm14, %v339_v34, %v341_v42  ;;  %1230 = vsinq.f32 %v287_v39  ;;  %v181_v17 = vsub.s32 4, %v1428_v16 }
  0xd0   :  { %v478_v53 = vsel %vm1175_vm15, 0, %v1174_v41  ;;  %vm97_vm0 = vcmp.lt.s32.totalorder %v1299_v45, 0  ;;  %v463_v58 = vadd.s32 %v1436_v63, %v1443_v6  ;;  %vm360_vm1 = vc.u32 %v1520_v47, %v1523_v49 }
  0xd1   :  { %v479_v62 = vsub.s32 32, %v478_v53  ;;  %v483_v0 = vsub.s32 4294967266, %v478_v53  ;;  %v180_v1 = vsel %vm97_vm0, %v179_v40, %v178_v20  ;;  %v361_v38 = vadd.s32 1, %v1524_v56 }
  0xd2   :  { %v292_v15 = vadd.s32 3, %v288_v57  ;;  %v480_v24 = vshll.u32 %v1485_v12, %v478_v53  ;;  %v358_v54 = vmul.u32 %v1461_v61, %v342_v55  ;;  %vm96_vm2 = vcmp.le.f32.partialorder %v95_v50, 0.7853982 }
  0xd3   :  { %v481_v4 = vshrl.u32 %v463_v58, %v479_v62  ;;  %v484_v8 = vadd.s32 127, %v483_v0  ;;  %v362_v63 = vsel %vm360_vm1, %v361_v38, %v1524_v56  ;;  %v182_v6 = vsel %vm97_vm0, %v181_v17, %v1428_v16 }
  0xd4   :  { %v363_v12 = vadd.s32 %v362_v63, %v358_v54  ;;  %v183_v19 = vsel %vm96_vm2, %v1299_v45, %v180_v1  ;;  %v293_v21 = vand.u32 3, %v292_v15  ;;  %v184_v50 = vsel %vm96_vm2, 0, %v182_v6 }
  0xd5   :  { %v482_v9 = vor.u32 %v481_v4, %v480_v24  ;;  %v485_v13 = vshll.u32 %v484_v8, 23  ;;  %1232 = vcosq.f32 %v183_v19  ;;  %vm291_vm3 = vweird.f32 %v1297_v44 }
  0xd6   :  { %v364_v48 = vadd.s32 536870912, %v363_v12  ;;  %1234 = vsinq.f32 %v183_v19  ;;  %v955_v27 = vmul.f32 %v1559_v11, %v1527_v51  ;;  %v188_v2 = vadd.s32 3, %v184_v50 }
  0xd7   :  { %v486_v61 = vor.u32 4788187, %v485_v13  ;;  %v489_v26 = vcvt.s32.f32 %v482_v9  ;;  %v493_v29 = vsub.s32 4, %v1470_v52  ;;  %vm298_vm4 = vcmp.eq.s32.totalorder %v293_v21, 2 }
  0xd8   :  { %v1229_v23 = vpop.eup %1228  ;;  %v1561_v25 = vshrl.u32 %v364_v48, 30  ;;  %vm409_vm5 = vcmp.lt.s32.totalorder %v1309_v59, 0  ;;  %vm295_vm6 = vcmp.eq.s32.totalorder %v293_v21, 0  ;;  %v707_v60 = vand.u32 3, %v288_v57  ;;  %v1585_v57 = vpop.permute.xlu0 %983 }
  0xd9   :  { %v487_v16 = vand.u32 2147483647, %v486_v61  ;;  %v1231_v30 = vpop.eup %1230  ;;  %v299_v31 = vxor.u32 2147483648, %v1229_v23  ;;  %vm294_vm7 = vcmp.lt.s32.totalorder %v293_v21, 2  ;;  %v189_v39 = vand.u32 3, %v188_v2 }
  0xda   :  { %v366_v32 = vshll.u32 %v1561_v25, 30  ;;  %v296_v7 = vxor.u32 2147483648, %v1231_v30  ;;  %vm1577_vm8 = vcmp.le.f32.partialorder %v407_v5, 0.7853982  ;;  %v494_v41 = vsel %vm409_vm5, %v493_v29, %v1470_v52  ;;  %v1593_v52 = vpop.permute.xlu1 %998  ;;  %v1610_v61 = vld [vmem:[%s1735_s4] ss:$0 sm:$0xff] }
  0xdb   :  { %v490_v18 = vmul.f32 %v489_v26, %v487_v16  ;;  %v300_v20 = vsel %vm298_vm4, %v299_v31, %v1231_v30  ;;  %v604_v56 = vand.u32 3, %v184_v50  ;;  %vm709_vm9 = vcmp.eq.s32.totalorder %v707_v60, 0 }
  0xdc   :  { %v1573_v34 = vsub.s32 %v363_v12, %v366_v32  ;;  %v297_v35 = vsel %vm295_vm6, %v1229_v23, %v296_v7  ;;  %vm187_vm10 = vweird.f32 %v1299_v45  ;;  %v496_v0 = vsel %vm1577_vm8, 0, %v494_v41  ;;  %v1599_v9 = vpop.permute.xlu0 %994  ;;  %v1633_v45 = vld [vmem:[%s1735_s4 + $0x1] ss:$0 sm:$0xff] }
  0xdd   :  { %v491_v33 = vxor.u32 2147483648, %v490_v18  ;;  %v301_v37 = vsel %vm294_vm7, %v297_v35, %v300_v20  ;;  %vm712_vm11 = vcmp.eq.s32.totalorder %v707_v60, 2  ;;  %vm194_vm12 = vcmp.eq.s32.totalorder %v189_v39, 2 }
  0xde   :  { %v369_v43 = vsub.s32 0, %v1573_v34  ;;  %v302_v46 = vsel %vm291_vm3, nan, %v301_v37  ;;  %vm191_vm13 = vcmp.eq.s32.totalorder %v189_v39, 0  ;;  %vm606_vm14 = vcmp.eq.s32.totalorder %v604_v56, 0  ;;  %v1605_v21 = vpop.permute.xlu1 %1038 }
  0xdf   :  { %v492_v42 = vsel %vm409_vm5, %v491_v33, %v490_v18  ;;  %v1233_v53 = vpop.eup %1232  ;;  %v1587_v55 = vadd.f32 %v955_v27, %v302_v46  ;;  %vm190_vm15 = vcmp.lt.s32.totalorder %v189_v39, 2  ;;  %vm609_vm0 = vcmp.eq.s32.totalorder %v604_v56, 2 }
  0xe0   :  { %v495_v5 = vsel %vm1577_vm8, %v1309_v59, %v492_v42  ;;  %v1235_v17 = vpop.eup %1234  ;;  %v1169_v58 = vmin.u32 %v369_v43, %v1573_v34  ;;  %v195_v62 = vxor.u32 2147483648, %v1233_v53  ;;  %v500_v4 = vadd.s32 3, %v496_v0 }
  0xe1   :  { %1236 = vcosq.f32 %v495_v5  ;;  %v192_v1 = vxor.u32 2147483648, %v1235_v17  ;;  %v711_v54 = vsel %vm709_vm9, %v1229_v23, %v296_v7  ;;  %v714_v63 = vsel %vm712_vm11, %v299_v31, %v1231_v30 }
  0xe2   :  { %1238 = vsinq.f32 %v495_v5  ;;  %v371_v38 = vclz %v1169_v58  ;;  %v196_v15 = vsel %vm194_vm12, %v195_v62, %v1235_v17  ;;  %v611_v19 = vsel %vm609_vm0, %v195_v62, %v1235_v17  ;;  %v1628_v37 = vpop.permute.xlu1 %1049 }
  0xe3   :  { %v193_v24 = vsel %vm191_vm13, %v1233_v53, %v192_v1  ;;  %v608_v12 = vsel %vm606_vm14, %v1233_v53, %v192_v1  ;;  %vm708_vm2 = vcmp.lt.s32.totalorder %v707_v60, 2  ;;  %vm605_vm4 = vcmp.lt.s32.totalorder %v604_v56, 2 }
  0xe4   :  { %v1170_v8 = vadd.s32 4294967294, %v371_v38  ;;  %v197_v6 = vsel %vm190_vm15, %v193_v24, %v196_v15  ;;  %v715_v50 = vsel %vm708_vm2, %v711_v54, %v714_v63  ;;  %v501_v23 = vand.u32 3, %v500_v4 }
  0xe5   :  { %v1603_v13 = vsel %vm187_vm10, nan, %v197_v6  ;;  %v913_v16 = vand.u32 3, %v496_v0  ;;  %v359_v26 = vadd.s32 %v1523_v49, %v1520_v47  ;;  %v612_v27 = vsel %vm605_vm4, %v608_v12, %v611_v19  ;;  %v1624_v49 = vpop.permute.xlu0 %1034  ;;  %v1200_v6 = vld [vmem:[%s1735_s4 + $0x2] ss:$0 sm:$0xff] }
  0xe6   :  { %vm1171_vm1 = vcmp.lt.s32.totalorder %v1170_v8, 0  ;;  %v968_v2 = vmul.f32 %v1610_v61, %v1527_v51  ;;  %v967_v29 = vmul.f32 %v1610_v61, %v1545_v22  ;;  %vm499_vm5 = vweird.f32 %v1309_v59  ;;  %v1649_v54 = vpop.permute.xlu1 %1089 }
  0xe7   :  { %v374_v48 = vsel %vm1171_vm1, 0, %v1170_v8  ;;  %v970_v18 = vmul.f32 %v1610_v61, %v1553_v10  ;;  %v716_v47 = vsel %vm291_vm3, nan, %v715_v50  ;;  %v613_v51 = vsel %vm187_vm10, nan, %v612_v27 }
  0xe8   :  { %v375_v30 = vsub.s32 32, %v374_v48  ;;  %v379_v31 = vsub.s32 4294967266, %v374_v48  ;;  %v376_v7 = vshll.u32 %v1573_v34, %v374_v48  ;;  %vm506_vm6 = vcmp.eq.s32.totalorder %v501_v23, 2 }
  0xe9   :  { %vm914_vm7 = vcmp.lt.s32.totalorder %v913_v16, 2  ;;  %vm918_vm8 = vcmp.eq.s32.totalorder %v913_v16, 2  ;;  %vm503_vm9 = vcmp.eq.s32.totalorder %v501_v23, 0  ;;  %vm915_vm11 = vcmp.eq.s32.totalorder %v913_v16, 0  ;;  %v1642_v38 = vpop.permute.xlu0 %1045 }
  0xea   :  { %v377_v20 = vshrl.u32 %v359_v26, %v375_v30  ;;  %v380_v60 = vadd.s32 127, %v379_v31  ;;  %vm502_vm3 = vcmp.lt.s32.totalorder %v501_v23, 2  ;;  %v972_v56 = vadd.f32 %v968_v2, %v716_v47  ;;  %v1203_v31 = vld [vmem:[%s1735_s4 + $0x3] ss:$0 sm:$0xff]  ;;  %s1251_s4 = smov 16  }
  0xeb   :  { %v1237_v32 = vpop.eup %1236  ;;  %v971_v53 = vadd.f32 %v967_v29, %v613_v51  ;;  %v389_v24 = vsub.s32 4, %v1561_v25  ;;  %v1019_v4 = vmul.f32 %v1633_v45, %v1569_v36  ;;  %v1018_v8 = vmul.f32 %v1633_v45, %v1585_v57 }
  0xec   :  { %v1239_v33 = vpop.eup %1238  ;;  %v507_v35 = vxor.u32 2147483648, %v1237_v32  ;;  %v378_v39 = vor.u32 %v377_v20, %v376_v7  ;;  %v381_v40 = vshll.u32 %v380_v60, 23  ;;  %v1021_v19 = vmul.f32 %v1633_v45, %v1593_v52 }
  0xed   :  { %v504_v41 = vxor.u32 2147483648, %v1239_v33  ;;  %v1023_v59 = vadd.f32 %v1019_v4, %v972_v56  ;;  %v1022_v12 = vadd.f32 %v1018_v8, %v971_v53  ;;  %vm305_vm10 = vcmp.lt.s32.totalorder %v1312_v3, 0  ;;  %v1665_v27 = vpop.permute.xlu0 %1085 }
  0xee   :  { %v508_v34 = vsel %vm506_vm6, %v507_v35, %v1239_v33  ;;  %v920_v44 = vsel %vm918_vm8, %v507_v35, %v1239_v33  ;;  %v382_v42 = vor.u32 4788187, %v381_v40  ;;  %v385_v62 = vcvt.s32.f32 %v378_v39 }
  0xef   :  { %v505_v43 = vsel %vm503_vm9, %v1237_v32, %v504_v41  ;;  %v917_v46 = vsel %vm915_vm11, %v1237_v32, %v504_v41  ;;  %v390_v50 = vsel %vm305_vm10, %v389_v24, %v1561_v25  ;;  %v1070_v16 = vmul.f32 %v1200_v6, %v1605_v21  ;;  %v1669_v32 = vpop.permute.xlu1 %1100 }
  0xf0   :  { %v509_v5 = vsel %vm502_vm3, %v505_v43, %v508_v34  ;;  %v921_v17 = vsel %vm914_vm7, %v917_v46, %v920_v44  ;;  %v383_v58 = vand.u32 2147483647, %v382_v42  ;;  %v1069_v26 = vmul.f32 %v1200_v6, %v1624_v49 }
  0xf1   :  { %v1638_v0 = vsel %vm499_vm5, nan, %v509_v5  ;;  %v922_v1 = vsel %vm499_vm5, nan, %v921_v17  ;;  %vm304_vm12 = vcmp.le.f32.partialorder %v303_v14, 0.7853982  ;;  %v1074_v29 = vadd.f32 %v1070_v16, %v1023_v59  ;;  %v1097_v24 = vpop.permute.xlu0 %1096  ;;  %v1199_v16 = vld [vmem:[%s1734_s3 + $0x2] ss:$0 sm:$0xff] }
  0xf2   :  { %v974_v15 = vadd.f32 %v970_v18, %v922_v1  ;;  %v386_v63 = vmul.f32 %v385_v62, %v383_v58  ;;  %v1073_v18 = vadd.f32 %v1069_v26, %v1022_v12  ;;  %v1072_v25 = vmul.f32 %v1200_v6, %v1628_v37 }
  0xf3   :  { %v392_v7 = vsel %vm304_vm12, 0, %v390_v50  ;;  %v1121_v14 = vmul.f32 %v1203_v31, %v1649_v54  ;;  %v1120_v60 = vmul.f32 %v1203_v31, %v1665_v27  ;;  %v1123_v47 = vmul.f32 %v1203_v31, %v1669_v32 }
  0xf4   :  { %v387_v48 = vxor.u32 2147483648, %v386_v63  ;;  %v1025_v23 = vadd.f32 %v1021_v19, %v974_v15  ;;  %v396_v35 = vadd.s32 3, %v392_v7  ;;  %v810_v41 = vand.u32 3, %v392_v7 }
  0xf5   :  { %v1125_v33 = vadd.f32 %v1121_v14, %v1074_v29  ;;  %v1124_v51 = vadd.f32 %v1120_v60, %v1073_v18  ;;  %vm395_vm4 = vweird.f32 %v1312_v3  ;;  %v969_v62 = vmul.f32 %v1610_v61, %v1564_v28  ;;  %v1196_v61 = vld [vmem:[%s1734_s3 + $0x1] ss:$0 sm:$0xff] }
  0xf6   :  { %v388_v30 = vsel %vm305_vm10, %v387_v48, %v386_v63  ;;  %v1076_v20 = vadd.f32 %v1072_v25, %v1025_v23  ;;  %v397_v40 = vand.u32 3, %v396_v35  ;;  %vm815_vm14 = vcmp.eq.s32.totalorder %v810_v41, 2 }
  0xf7   :  { %v391_v2 = vsel %vm304_vm12, %v1312_v3, %v388_v30  ;;  %1134 = vrot.lane.b32.xlu1 %v1125_v33, %s1251_s4  ;;  %1132 = vrot.lane.b32.xlu0 %v1124_v51, %s1251_s4  ;;  %vm812_vm0 = vcmp.eq.s32.totalorder %v810_v41, 0  ;;  %vm811_vm2 = vcmp.lt.s32.totalorder %v810_v41, 2  ;;  %v1020_v8 = vmul.f32 %v1633_v45, %v1599_v9 }
  0xf8   :  { %1240 = vcosq.f32 %v391_v2  ;;  %v1127_v39 = vadd.f32 %v1123_v47, %v1076_v20  ;;  %vm402_vm13 = vcmp.eq.s32.totalorder %v397_v40, 2  ;;  %vm399_vm15 = vcmp.eq.s32.totalorder %v397_v40, 0 }
  0xf9   :  { %1242 = vsinq.f32 %v391_v2  ;;  %vm398_vm1 = vcmp.lt.s32.totalorder %v397_v40, 2  ;;  %v1071_v59 = vmul.f32 %v1200_v6, %v1642_v38  ;;  %v1122_v12 = vmul.f32 %v1203_v31, %v1097_v24 }
  0xfa   :  { %v954_v3 = vmul.f32 %v1559_v11, %v1545_v22  ;;  %v957_v45 = vmul.f32 %v1559_v11, %v1553_v10  ;;  %v1006_v23 = vmul.f32 %v1196_v61, %v1569_v36  ;;  %v1005_v6 = vmul.f32 %v1196_v61, %v1585_v57 }
  0xfb   :  { %1138 = vrot.lane.b32.xlu1 %v1127_v39, %s1251_s4  ;;  %v1008_v31 = vmul.f32 %v1196_v61, %v1593_v52  ;;  %v1057_v10 = vmul.f32 %v1199_v16, %v1605_v21  ;;  %v1056_v36 = vmul.f32 %v1199_v16, %v1624_v49  ;;  %vm1144_vm5 = vcmask 130048  }
  0xfc   :  { %v958_v50 = vadd.f32 %v954_v3, %v1603_v13  ;;  %v961_v26 = vadd.f32 %v957_v45, %v1638_v0  ;;  %v1010_v22 = vadd.f32 %v1006_v23, %v1587_v55  ;;  %v1202_v13 = vld [vmem:[%s1734_s3 + $0x3] ss:$0 sm:$0xff]  ;;  %v1059_v55 = vmul.f32 %v1199_v16, %v1628_v37 }
  0xfd   :  { %v1108_v29 = vmul.f32 %v1202_v13, %v1649_v54  ;;  %v1107_v0 = vmul.f32 %v1202_v13, %v1665_v27  ;;  %v1110_v14 = vmul.f32 %v1202_v13, %v1669_v32  ;;  %vm1151_vm6 = vcmask 253952  }
  0xfe   :  { %v1009_v30 = vadd.f32 %v1005_v6, %v958_v50  ;;  %v1012_v57 = vadd.f32 %v1008_v31, %v961_v26  ;;  %v1061_v2 = vadd.f32 %v1057_v10, %v1010_v22  ;;  %vm1149_vm7 = vcmask 261120  }
  0xff   :  { %v956_v27 = vmul.f32 %v1559_v11, %v1564_v28  ;;  %v1007_v33 = vmul.f32 %v1196_v61, %v1599_v9  ;;  %v1058_v35 = vmul.f32 %v1199_v16, %v1642_v38  ;;  %v1109_v40 = vmul.f32 %v1202_v13, %v1097_v24 }
 0x100   :  { %v1060_v18 = vadd.f32 %v1056_v36, %v1009_v30  ;;  %v1063_v25 = vadd.f32 %v1059_v55, %v1012_v57  ;;  %v1112_v7 = vadd.f32 %v1108_v29, %v1061_v2 }
 0x102   :  { %v1241_v34 = vpop.eup %1240  ;;  %v1111_v20 = vadd.f32 %v1107_v0, %v1060_v18  ;;  %v1114_v37 = vadd.f32 %v1110_v14, %v1063_v25 }
 0x103   :  { %v1243_v44 = vpop.eup %1242  ;;  %v403_v42 = vxor.u32 2147483648, %v1241_v34 }
 0x104   :  { %v400_v43 = vxor.u32 2147483648, %v1243_v44 }
 0x105   :  { %v404_v46 = vsel %vm402_vm13, %v403_v42, %v1243_v44  ;;  %v817_v56 = vsel %vm815_vm14, %v403_v42, %v1243_v44 }
 0x106   :  { %v401_v53 = vsel %vm399_vm15, %v1241_v34, %v400_v43  ;;  %v814_v5 = vsel %vm812_vm0, %v1241_v34, %v400_v43 }
 0x107   :  { %v405_v17 = vsel %vm398_vm1, %v401_v53, %v404_v46  ;;  %v818_v58 = vsel %vm811_vm2, %v814_v5, %v817_v56 }
 0x108   :  { %v406_v1 = vsel %vm395_vm4, nan, %v405_v17  ;;  %v819_v15 = vsel %vm395_vm4, nan, %v818_v58 }
 0x109   :  { %v973_v4 = vadd.f32 %v969_v62, %v819_v15  ;;  %v960_v47 = vadd.f32 %v956_v27, %v406_v1 }
 0x10b   :  { %v1024_v63 = vadd.f32 %v1020_v8, %v973_v4  ;;  %v1011_v51 = vadd.f32 %v1007_v33, %v960_v47 }
 0x10d   :  { %v1075_v19 = vadd.f32 %v1071_v59, %v1024_v63  ;;  %v1062_v39 = vadd.f32 %v1058_v35, %v1011_v51 }
 0x10f   :  { %v1126_v48 = vadd.f32 %v1122_v12, %v1075_v19  ;;  %v1113_v41 = vadd.f32 %v1109_v40, %v1062_v39 }
 0x111   :  { %1136 = vrot.lane.b32.xlu0 %v1126_v48, %s1251_s4 }
 0x169   :  { %v1135_v52 = vpop.permute.xlu1 %1134  ;;  %v1133_v21 = vpop.permute.xlu0 %1132 }
 0x16a   :  { %v1146_v49 = vsel %vm1144_vm5, %v1112_v7, %v1135_v52  ;;  %v1145_v60 = vsel %vm1144_vm5, %v1111_v20, %v1133_v21 }
 0x16b   :  { %1152 = vst.msk [vmem:[%s1736_s5 + $0x8] sm:$0x1] %vm1151_vm6, %v1146_v49 }
 0x16c   :  { %1150 = vst.msk [vmem:[%s1736_s5] sm:$0xff] %vm1149_vm7, %v1145_v60 }
 0x16d   :  { %v1139_v54 = vpop.permute.xlu1 %1138 }
 0x16e   :  { %v1148_v32 = vsel %vm1144_vm5, %v1114_v37, %v1139_v54 }
 0x16f   :  { %1154 = vst.msk [vmem:[%s1736_s5 + $0x18] sm:$0x1] %vm1151_vm6, %v1148_v32 }
 0x183   :  { %v1137_v34 = vpop.permute.xlu0 %1136 }
 0x184   :  { %v1147_v44 = vsel %vm1144_vm5, %v1113_v41, %v1137_v34 }
 0x185   :  { %1153 = vst.msk [vmem:[%s1736_s5 + $0x10] sm:$0xff] %vm1149_vm7, %v1147_v44 }

</bundles_post_ra>
